<compile_context>
chip_gen: v6e
topology: v6e:2x2x1
jax: 0.10.0
libtpu: 0.0.40
codegen_flags: <defaults>
</compile_context>

<pallas_src>
import math
import jax
import jax.numpy as jnp
from jax.experimental import pallas as pl
from jax.experimental.pallas import tpu as pltpu


def _round_up(x, m):
    return ((x + m - 1) // m) * m


def _output_kernel(x_ref, w_ref, b_ref, scl_ref, off_ref, o_ref):
    # x_ref:  (32, TM)  channels on sublanes, spatial on lanes (lane-dense)
    # w_ref:  (6, 32)   fused [score, loc0..3, angle] 1x1-conv weights
    # b_ref / scl_ref / off_ref: (6, 1) columns broadcast along lanes
    # o_ref:  (6, TM)   lane-dense output block
    y = jnp.dot(w_ref[...], x_ref[...], preferred_element_type=jnp.float32)
    y = jax.nn.sigmoid(y + b_ref[...])
    # folded affine: (sig + off) * scl  ==  sig * scl + (off * scl)
    o_ref[...] = (y * scl_ref[...] + off_ref[...]).astype(o_ref.dtype)


def output_forward(x_nchw, w, b, scope=512.0, tile_m=4096):
    """EAST-style output head.

    x_nchw: (N, 32, H, W).  w: (6, 32) fused weights, rows = [score, loc0..3,
    angle].  b: (6,) fused bias.  Returns (score, geo) = (N,1,H,W), (N,5,H,W)
    float32, matching the PyTorch module's forward.
    """
    N, C, H, W = x_nchw.shape
    assert C == 32
    HW = H * W
    cout = 6

    # Free reshape of NCHW -> channels-on-sublane layout; no transpose pass.
    x3d = x_nchw.reshape(N, C, HW)

    # Large lane tile to amortize per-step overhead; clamp to the spatial size
    # (rounded up to the 128-lane granule).  Edge blocks are masked by Pallas,
    # so no jnp.pad copy is needed.
    tile = min(tile_m, _round_up(HW, 128))
    grid = (N, pl.cdiv(HW, tile))

    wk = jnp.asarray(w, x3d.dtype).reshape(cout, C)
    bias = jnp.asarray(b, jnp.float32).reshape(cout, 1)
    # row order: [score, loc0..3, angle]
    scale = jnp.array(
        [1.0, scope, scope, scope, scope, math.pi], jnp.float32
    ).reshape(cout, 1)
    offset = jnp.array(
        [0.0, 0.0, 0.0, 0.0, 0.0, -0.5], jnp.float32
    ).reshape(cout, 1) * scale  # pre-folded offset*scale

    out3d = pl.pallas_call(
        _output_kernel,
        out_shape=jax.ShapeDtypeStruct((N, cout, HW), jnp.float32),
        grid_spec=pltpu.PrefetchScalarGridSpec(
            num_scalar_prefetch=0,
            grid=grid,
            in_specs=[
                pl.BlockSpec((None, C, tile), lambda n, i: (n, 0, i)),
                pl.BlockSpec((cout, C), lambda n, i: (0, 0)),
                pl.BlockSpec((cout, 1), lambda n, i: (0, 0)),
                pl.BlockSpec((cout, 1), lambda n, i: (0, 0)),
                pl.BlockSpec((cout, 1), lambda n, i: (0, 0)),
            ],
            out_specs=pl.BlockSpec((None, cout, tile), lambda n, i: (n, 0, i)),
        ),
        compiler_params=pltpu.CompilerParams(
            dimension_semantics=("parallel", "parallel"),
        ),
    )(x3d, wk, bias, scale, offset)

    out = out3d.reshape(N, cout, H, W)  # free reshape back to NCHW layout
    score = out[:, 0:1]                 # (N, 1, H, W)
    geo = out[:, 1:6]                   # (N, 5, H, W) = cat(loc, angle)
    return score, geo


def init_params(key):
    # Kaiming normal, fan_out mode, relu gain: std = sqrt(2 / fan_out),
    # fan_out = out_channels for a 1x1 conv.  Bias = 0.
    k1, k2, k3 = jax.random.split(key, 3)
    w1 = jax.random.normal(k1, (1, 32), jnp.float32) * math.sqrt(2.0 / 1.0)
    w2 = jax.random.normal(k2, (4, 32), jnp.float32) * math.sqrt(2.0 / 4.0)
    w3 = jax.random.normal(k3, (1, 32), jnp.float32) * math.sqrt(2.0 / 1.0)
    w = jnp.concatenate([w1, w2, w3], axis=0)  # (6, 32): [score, loc0..3, angle]
    b = jnp.zeros((6,), jnp.float32)
    return w, b


if __name__ == "__main__":
    key = jax.random.PRNGKey(0)
    kx, kp = jax.random.split(key)
    # small NCHW input consistent with the module: batch=2, C=32, H=W=16
    x = jax.random.normal(kx, (2, 32, 16, 16), jnp.float32)
    w, b = init_params(kp)

    score, geo = output_forward(x, w, b, scope=512.0)
    jax.block_until_ready((score, geo))

    # pure-JAX reference (same free NCHW -> (N,C,HW) view, no transposes)
    x3 = x.reshape(2, 32, 16 * 16)
    y = jax.nn.sigmoid(
        jnp.einsum("oc,ncm->nom", w, x3, preferred_element_type=jnp.float32)
        + b.reshape(1, 6, 1)
    )
    score_ref = y[:, 0:1].reshape(2, 1, 16, 16)
    loc_ref = (y[:, 1:5] * 512.0).reshape(2, 4, 16, 16)
    ang_ref = ((y[:, 5:6] - 0.5) * math.pi).reshape(2, 1, 16, 16)
    geo_ref = jnp.concatenate([loc_ref, ang_ref], axis=1)

    assert score.shape == (2, 1, 16, 16) and geo.shape == (2, 5, 16, 16)
    assert jnp.allclose(score, score_ref, atol=1e-4, rtol=1e-5)
    assert jnp.allclose(geo, geo_ref, atol=1e-3, rtol=1e-4)

    # bf16 activation/weight path (halves HBM read traffic of the mem-bound
    # kernel when the upstream network produces bf16); output stays f32.
    score16, geo16 = output_forward(x.astype(jnp.bfloat16), w, b, scope=512.0)
    jax.block_until_ready((score16, geo16))
    assert score16.shape == (2, 1, 16, 16) and geo16.shape == (2, 5, 16, 16)
    assert bool(jnp.isfinite(score16).all()) and bool(jnp.isfinite(geo16).all())

    print("KERNEL_OK")
</pallas_src>

<mosaic_0001>
module attributes {stable_mosaic.version = 11 : i64} {
  func.func @_output_kernel(%arg0: i32, %arg1: i32, %arg2: memref<1x32x256xf32, #tpu.memory_space<vmem>>, %arg3: memref<6x32xf32, #tpu.memory_space<vmem>>, %arg4: memref<6x1xf32, #tpu.memory_space<vmem>>, %arg5: memref<6x1xf32, #tpu.memory_space<vmem>>, %arg6: memref<6x1xf32, #tpu.memory_space<vmem>>, %arg7: memref<1x6x256xf32, #tpu.memory_space<vmem>>) attributes {dimension_semantics = [#tpu.dimension_semantics<parallel>, #tpu.dimension_semantics<parallel>], iteration_bounds = array<i64: 2, 1>, scalar_prefetch = 0 : i64, scratch_operands = 0 : i64, tpu.core_type = #tpu.core_type<tc>, window_params = [{transform_indices = @transform_0, window_bounds = array<i64: 1, 32, 256>}, {pipeline_mode = #tpu.pipeline_mode<synchronous>, transform_indices = @transform_1, window_bounds = array<i64: 6, 32>}, {pipeline_mode = #tpu.pipeline_mode<synchronous>, transform_indices = @transform_2, window_bounds = array<i64: 6, 1>}, {pipeline_mode = #tpu.pipeline_mode<synchronous>, transform_indices = @transform_3, window_bounds = array<i64: 6, 1>}, {pipeline_mode = #tpu.pipeline_mode<synchronous>, transform_indices = @transform_4, window_bounds = array<i64: 6, 1>}, {transform_indices = @transform_5, window_bounds = array<i64: 1, 6, 256>}]} {
    %c0 = arith.constant 0 : index
    %c0_0 = arith.constant 0 : index
    %0 = vector.load %arg3[%c0, %c0_0] : memref<6x32xf32, #tpu.memory_space<vmem>>, vector<6x32xf32>
    %c0_1 = arith.constant 0 : index
    %c0_2 = arith.constant 0 : index
    %c0_3 = arith.constant 0 : index
    %1 = vector.load %arg2[%c0_1, %c0_2, %c0_3] : memref<1x32x256xf32, #tpu.memory_space<vmem>>, vector<1x32x256xf32>
    %2 = vector.shape_cast %1 : vector<1x32x256xf32> to vector<32x256xf32>
    %cst = arith.constant dense<0.000000e+00> : vector<6x256xf32>
    %3 = tpu.matmul %0, %2, %cst {dimension_numbers = #tpu.dot_dimension_numbers<[1], [0], [0], [1], [0, 0, 1, 1], [], []>} : vector<6x32xf32>, vector<32x256xf32>, vector<6x256xf32> -> vector<6x256xf32>
    %c0_4 = arith.constant 0 : index
    %c0_5 = arith.constant 0 : index
    %4 = vector.load %arg4[%c0_4, %c0_5] : memref<6x1xf32, #tpu.memory_space<vmem>>, vector<6x1xf32>
    %5 = vector.broadcast %4 : vector<6x1xf32> to vector<6x256xf32>
    %6 = arith.addf %3, %5 : vector<6x256xf32>
    %7 = arith.negf %6 : vector<6x256xf32>
    %8 = math.exp %7 : vector<6x256xf32>
    %cst_6 = arith.constant 1.000000e+00 : f32
    %9 = vector.broadcast %cst_6 : f32 to vector<6x256xf32>
    %10 = arith.addf %9, %8 : vector<6x256xf32>
    %11 = arith.divf %9, %10 : vector<6x256xf32>
    %c0_7 = arith.constant 0 : index
    %c0_8 = arith.constant 0 : index
    %12 = vector.load %arg5[%c0_7, %c0_8] : memref<6x1xf32, #tpu.memory_space<vmem>>, vector<6x1xf32>
    %13 = vector.broadcast %12 : vector<6x1xf32> to vector<6x256xf32>
    %14 = arith.mulf %11, %13 : vector<6x256xf32>
    %c0_9 = arith.constant 0 : index
    %c0_10 = arith.constant 0 : index
    %15 = vector.load %arg6[%c0_9, %c0_10] : memref<6x1xf32, #tpu.memory_space<vmem>>, vector<6x1xf32>
    %16 = vector.broadcast %15 : vector<6x1xf32> to vector<6x256xf32>
    %17 = arith.addf %14, %16 : vector<6x256xf32>
    %c0_11 = arith.constant 0 : index
    %c0_12 = arith.constant 0 : index
    %c0_13 = arith.constant 0 : index
    %18 = vector.load %arg7[%c0_11, %c0_12, %c0_13] : memref<1x6x256xf32, #tpu.memory_space<vmem>>, vector<1x6x256xf32>
    %19 = vector.shape_cast %18 : vector<1x6x256xf32> to vector<6x256xf32>
    %20 = vector.shape_cast %17 : vector<6x256xf32> to vector<1x6x256xf32>
    tpu.vector_store %arg7[%c0_11, %c0_12, %c0_13], %20 {strides = array<i32>} : memref<1x6x256xf32, #tpu.memory_space<vmem>>, vector<1x6x256xf32>,
    return
  }
  func.func @transform_0(%arg0: i32, %arg1: i32) -> (i32, i32, i32) {
    %c0_i32 = arith.constant 0 : i32
    %c0_i32_0 = arith.constant 0 : i32
    return %arg0, %c0_i32, %arg1 : i32, i32, i32
  }
  func.func @transform_1(%arg0: i32, %arg1: i32) -> (i32, i32) {
    %c0_i32 = arith.constant 0 : i32
    %c0_i32_0 = arith.constant 0 : i32
    %c0_i32_1 = arith.constant 0 : i32
    return %c0_i32, %c0_i32_0 : i32, i32
  }
  func.func @transform_2(%arg0: i32, %arg1: i32) -> (i32, i32) {
    %c0_i32 = arith.constant 0 : i32
    %c0_i32_0 = arith.constant 0 : i32
    %c0_i32_1 = arith.constant 0 : i32
    return %c0_i32, %c0_i32_0 : i32, i32
  }
  func.func @transform_3(%arg0: i32, %arg1: i32) -> (i32, i32) {
    %c0_i32 = arith.constant 0 : i32
    %c0_i32_0 = arith.constant 0 : i32
    %c0_i32_1 = arith.constant 0 : i32
    return %c0_i32, %c0_i32_0 : i32, i32
  }
  func.func @transform_4(%arg0: i32, %arg1: i32) -> (i32, i32) {
    %c0_i32 = arith.constant 0 : i32
    %c0_i32_0 = arith.constant 0 : i32
    %c0_i32_1 = arith.constant 0 : i32
    return %c0_i32, %c0_i32_0 : i32, i32
  }
  func.func @transform_5(%arg0: i32, %arg1: i32) -> (i32, i32, i32) {
    %c0_i32 = arith.constant 0 : i32
    %c0_i32_0 = arith.constant 0 : i32
    return %arg0, %c0_i32, %arg1 : i32, i32, i32
  }
}

</mosaic_0001>

<bundles_post_ra>
// kernel: tpu_custom_call.1
= control target key start
LH: loop header
LB: loop body
LE: loop exit
PB: predicated region body
PF: predicated region fallthrough
CT: control target
= control target key end

     0   :  { %10 = vsyncpa [#allocation3], 0  ;;  %s798_s0 = inlined_call_operand.hbm [shape: f32[2,32,256], index: 0, kind: input, shape index: {}]   ;;  %s799_s1 = inlined_call_operand.vmem [shape: f32[6,32], index: 1, kind: input, shape index: {}]   ;;  %s800_s2 = inlined_call_operand.vmem [shape: f32[6,1], index: 2, kind: input, shape index: {}]   ;;  %s801_s3 = inlined_call_operand.vmem [shape: f32[6,1], index: 3, kind: input, shape index: {}]   ;;  %s802_s4 = inlined_call_operand.vmem [shape: f32[6,1], index: 4, kind: input, shape index: {}]   ;;  %s803_s5 = inlined_call_operand.vmem [shape: f32[2,6,256], index: 5, kind: output, shape index: {}]  }
   0x1   :  { %12 = vsyncpa [#allocation3 + $0x1], 0  ;;  %s690_s18 = smov 0   ;;  %s692_s19 = smov 0  }
   0x2   :  { %s694_s20 = smov 0   ;;  %s696_s21 = smov 0  }
   0x3   :  { %s698_s22 = smov 0   ;;  %s700_s23 = smov 0  }
   0x4 LB: > { %s488_s24 = sadd.s32 4294967295, %s653_s23   ;;  %s30_s25 = sadd.s32 1, %s649_s22  ;;  %s653_s23 = sphi %s700_s23, %s18_s23   ;;  %s649_s22 = sphi %s698_s22, %s811_s22   ;;  %s645_s21 = sphi %s696_s21, %s810_s21   ;;  %s641_s20 = sphi %s694_s20, %s809_s20   ;;  %s637_s19 = sphi %s692_s19, %s808_s19   ;;  %s633_s18 = sphi %s690_s18, %s807_s18  }
   0x5   : > { %p32_p0 = scmp.ge.s32.totalorder %s30_s25, 2  ;;  %s39_s26 = sadd.s32 1, %s641_s20 }
   0x6   : > { %p46_p1 = scmp.ne.s32.totalorder %s641_s20, %s637_s19  ;;  %p47_p2 = scmp.eq.s32.totalorder %s653_s23, 0 }
   0x7   : > { %s813_s25 = smov (%p32_p0, %s30_s25), 0  ;;  %p52_p4 = scmp.ne.s32.totalorder %s637_s19, %s633_s18 }
   0x8   : > { %p726_p3 = por %p47_p2, %p46_p1  ;;  %s34_s28 = ssub.s32 %s649_s22, %s813_s25 }
   0x9   : > { %p53_p5 = scmp.eq.s32.totalorder %s488_s24, 0  ;;  %p37_p6 = scmp.eq.s32.totalorder %s34_s28, 0 }
   0xa   : > { %p512_p8 = scmp.lt.s32.totalorder %s653_s23, 2  ;;  %s200_s6 = sand.u32 1, %s641_s20  }
   0xb   : > { %p733_p7 = por %p53_p5, %p52_p4  ;;  %s504_s7 = sshll.u32 %s649_s22, 10 }
   0xc   : > { %s739_s30 = scalar_select %p37_p6, %s641_s20, %s39_s26  }
   0xd   : > { %s492_s8 = sshll.u32 %s200_s6, 6  ;;  %s212_s11 = scalar_lea.hbm %s798_s0, %s504_s7 }
   0xe   : > { %s204_s12 = scalar_lea.vmem [#allocation2], %s492_s8  ;;  %p748_p9 = pnand %p512_p8, %p726_p3 }
   0xf   : > { %s213_s13 = sshll.u32 %s204_s12, 4  ;;  %s201_s15 = scalar_lea.sflag [#allocation3], %s200_s6  ;;  %s214_s13 = int_to_ptr.vmem [resolvable:$true] %s213_s13 }
  0x10   : > { %p577_p10 = pneg %p748_p9  ;;  %s588_s16 = scalar_lea.vmem %s214_s13, 1024 }
  0x11   : > { %p589_p11 = scmp.ne.s32.totalorder %s214_s13, %s588_s16  ;;  %s655_s17 = smov [#allocation2]  }
  0x12   : > { %s593_s18 = sshll.u32 %s655_s17, 4  ;;  %s594_s18 = int_to_ptr.vmem [resolvable:$false] %s593_s18 }
  0x13   : > { %p591_p12 = pnand %p589_p11, %p577_p10  ;;  %s595_s24 = scalar_lea.vmem %s594_s18, 2048 }
  0x14   : > { %p596_p0 = scmp.lt.s32.totalorder %s214_s13, %s594_s18  ;;  %p597_p1 = scmp.lt.s32.totalorder %s595_s24, %s588_s16 }
  0x15   : > { %p592_p13 = pneg %p591_p12 }
  0x16   : > { %p598_p2 = por %p597_p1, %p596_p0 }
  0x18   : > { %p599_p3 = pnand %p598_p2, %p592_p13 }
  0x1a   : > { %602 = shalt.err (!%p599_p3)
}
  0x1b   : > { %s656_s26 = smov 256   ;;  %s657_s27 = smov 16  }
  0x1c   : > { %511 = dma.hbm_to_vmem [thread:$0]  (!%p748_p9), %s212_s11, 1024, %s214_s13, %s201_s15, %s656_s26, %s656_s26, %s657_s27  }
  0x1d   : > { %p495_p4 = scmp.ge.s32.totalorder %s653_s23, 1  ;;  %p221_p5 = scmp.lt.s32.totalorder %s653_s23, 3 }
  0x1f   : > { %p222_p6 = pnand %p495_p4, %p221_p5 }
  0x20   : > { %s227_s28 = sand.u32 (!%p222_p6), 1, %s637_s19  }
  0x21   : > { %225 = sbr.rel (%p222_p6) target bundleno = 283 (0x11b), region = 40  ;;  %s496_s6 = sshll.u32 (!%p222_p6), %s227_s28, 6 }
  0x22   : > { %s228_s7 = scalar_lea.sflag (!%p222_p6), [#allocation3], %s227_s28  ;;  %s231_s8 = scalar_lea.vmem (!%p222_p6), [#allocation2], %s496_s6 }
  0x26   : > { %628 = dma.done.wait (%p733_p7), %s228_s7, 1024  }
  0x27   : > { %630 = vsyncadd (%p733_p7), %s228_s7, 4294966272  ;;  %v658_v0 = vmov 0.0   ;;  %v659_v1 = vmov 0   ;;  %v281_v2 = vld [vmem:[%s231_s8 + $0x38] sm:$0xff]  ;;  %v280_v3 = vld [vmem:[%s231_s8 + $0x30] sm:$0xff]  ;;  %vm288_vm0 = vcmask 261120  }
  0x28   : > { %356 = vmatprep.mubr.f32.mxu0 %v658_v0  ;;  %565 = vset.pattern.permute.xlu0 %v659_v1  ;;  %v279_v4 = vld [vmem:[%s231_s8 + $0x28] sm:$0xff]  ;;  %v278_v5 = vld [vmem:[%s231_s8 + $0x20] sm:$0xff]  ;;  %v277_v6 = vld [vmem:[%s231_s8 + $0x18] sm:$0xff]  ;;  %p264_p7 = scmp.lt.s32.totalorder %s645_s21, 1 }
  0x29   : > { %566 = vset.pattern.permute.xlu1 %v659_v1  ;;  %316 = vmatprep.subr.mxu0 %v281_v2  ;;  %v276_v7 = vld [vmem:[%s231_s8 + $0x10] sm:$0xff]  ;;  %v282_v8 = vld [vmem:[%s800_s2] sm:$0x3f]  ;;  %v275_v10 = vld [vmem:[%s231_s8 + $0x8] sm:$0xff] }
  0x2a   : > { %317 = vmatpush1.msra.mxu0 %v280_v3  ;;  %v383_v9 = vld [vmem:[%s802_s4] sm:$0x3f]  ;;  %285 = vperm.xlu0 %565, %v282_v8   ;;  %s815_s21 = smov (!%p264_p7, %s645_s21), 1 }
  0x2b   : > { %318 = vmatprep.subr.mxu0 %v279_v4  ;;  %v274_v11 = vld [vmem:[%s231_s8] sm:$0xff]  ;;  %386 = vperm.xlu1 %566, %v383_v9   ;;  %s505_s16 = sshll.u32 %s815_s21, 4 }
  0x2c   : > { %319 = vmatpush1.msra.mxu0 %v278_v5  ;;  %v375_v12 = vld [vmem:[%s801_s3] sm:$0x3f]  ;;  %s271_s24 = scalar_lea.vmem %s803_s5, %s505_s16 }
  0x2d   : > { %320 = vmatprep.subr.mxu0 %v277_v6  ;;  %v273_v13 = vld [vmem:[%s799_s1] sm:$0x3f] }
  0x2e   : > { %321 = vmatpush1.msra.mxu0 %v276_v7  ;;  %378 = vperm.xlu0 %565, %v375_v12  }
  0x2f   : > { %322 = vmatprep.subr.mxu0 %v275_v10 }
  0x30   : > { %323 = vmatpush1.msra.mxu0 %v274_v11 }
  0x31   : > { %499 = vmatmul.mubr.msk.f32.vlgmr.msra.gmra.mxu0 %vm288_vm0, %v273_v13 }
  0xa5   : > { %v286_v14 = vpop.permute.xlu0 %285 }
  0xa6   : > { %v387_v27 = vpop.permute.xlu1 %386 }
  0xa9   : > { %v379_v26 = vpop.permute.xlu0 %378 }
  0xf1   : > { %v358_v15 = vpop.f32.mrf.mxu0 }
  0xf2   : > { %v359_v16 = vadd.f32 %v358_v15, %v286_v14 }
  0xf3   : > { %v360_v17 = vpop.f32.mrf.mxu0 }
  0xf4   : > { %v500_v18 = vmul.f32 -1.442695, %v359_v16  ;;  %v361_v19 = vadd.f32 %v360_v17, %v286_v14 }
  0xf6   : > { %567 = vpow2.f32 %v500_v18  ;;  %v501_v20 = vmul.f32 -1.442695, %v361_v19 }
  0xf8   : > { %569 = vpow2.f32 %v501_v20 }
 0x103   : > { %v568_v21 = vpop.eup %567 }
 0x104   : > { %v369_v22 = vadd.f32 1.0, %v568_v21 }
 0x105   : > { %v570_v23 = vpop.eup %569 }
 0x106   : > { %571 = vrcp.f32 %v369_v22  ;;  %v370_v24 = vadd.f32 1.0, %v570_v23 }
 0x108   : > { %573 = vrcp.f32 %v370_v24 }
 0x113   : > { %v572_v25 = vpop.eup %571 }
 0x114   : > { %v381_v28 = vmul.f32 %v572_v25, %v379_v26 }
 0x115   : > { %v574_v29 = vpop.eup %573 }
 0x116   : > { %v382_v30 = vmul.f32 %v574_v29, %v379_v26  ;;  %v389_v31 = vadd.f32 %v387_v27, %v381_v28 }
 0x118   : > { %v390_v32 = vadd.f32 %v387_v27, %v382_v30  ;;  %391 = vst [vmem:[%s271_s24] sm:$0x3f] %v389_v31 }
 0x11a   : > { %392 = vst [vmem:[%s271_s24 + $0x8] sm:$0x3f] %v390_v32 }
 0x11b PF: > { %s18_s23 = sadd.s32 1, %s653_s23   ;;  %s807_s18 = smov %s637_s19 }
 0x11c   : > { %p15_p8 = scmp.ge.s32.totalorder %s18_s23, 4   ;;  %s808_s19 = smov %s641_s20 }
 0x11d   : > { %s809_s20 = smov %s739_s30  ;;  %s810_s21 = smov %s649_s22 }
 0x11e   : > { %s811_s22 = smov %s813_s25  ;;  %17 = sbr.rel (!%p15_p8) target bundleno = 4 (0x4), region = 80 }
 0x123   :  { %423 = vsyncpa [#allocation3], 1 }
 0x124   :  { %425 = vsyncpa [#allocation3 + $0x1], 1 }

</bundles_post_ra>
